<compile_context>
chip_gen: v6e
topology: v6e:2x2x1
jax: 0.10.0
libtpu: 0.0.40
codegen_flags: <defaults>
</compile_context>

<pallas_src>
import jax
import jax.numpy as jnp
from jax.experimental import pallas as pl
from jax.experimental.pallas import tpu as pltpu


def _round_up(n, m):
    return ((n + m - 1) // m) * m


def _rnn_cell_kernel(x_ref, h_ref, wi_ref, wh_ref, o_ref):
    # Two MXU matmuls into a single f32 accumulator, EUP tanh on the f32 result,
    # then cast + lane-dense store.  (Mosaic keeps f32 operands at full precision.)
    acc = jnp.dot(h_ref[...], wh_ref[...], preferred_element_type=jnp.float32)
    acc = acc + jnp.dot(x_ref[...], wi_ref[...], preferred_element_type=jnp.float32)
    o_ref[...] = jnp.tanh(acc).astype(o_ref.dtype)


def rnn_cell(x, h, w_i, w_h, *, batch_block=512, hidden_block=512):
    """h_new = tanh(h @ w_h + x @ w_i), matching the PyTorch RNNCell.forward."""
    B, input_size = x.shape
    Bh, hidden_size = h.shape
    assert Bh == B
    assert w_i.shape == (input_size, hidden_size)
    assert w_h.shape == (hidden_size, hidden_size)

    out_dtype = h.dtype
    itemsize = jnp.dtype(out_dtype).itemsize
    MiB = 1024 * 1024

    # ---- batch tiling: balanced, sublane-aligned tiles; minimal padding ----
    if B > batch_block:
        n_b_target = pl.cdiv(B, batch_block)
        tb = _round_up(pl.cdiv(B, n_b_target), 8)
        B_pad = _round_up(B, tb)
        n_b = B_pad // tb
    else:
        tb, B_pad, n_b = B, B, 1

    # ---- hidden (output/N) tiling: only when lane-aligned and large; keeps each
    #      grid step's resident weight slice small (v7x 64 MiB VMEM) and lets the
    #      two v7x TensorCores split the weight read instead of duplicating it ----
    if hidden_size % 128 == 0 and hidden_size > hidden_block:
        tn = max(128, (min(hidden_block, hidden_size) // 128) * 128)
        while hidden_size % tn != 0:
            tn -= 128
        n_h = hidden_size // tn
    else:
        tn, n_h = hidden_size, 1

    if B_pad > B:
        pad = ((0, B_pad - B), (0, 0))
        x = jnp.pad(x, pad)
        h = jnp.pad(h, pad)

    out_shape = jax.ShapeDtypeStruct((B_pad, hidden_size), out_dtype)

    if n_b == 1 and n_h == 1:
        # Everything fits as single VMEM-resident blocks: no grid, no 1-step pipeline,
        # no padding at all (block shape == full array shape, so no (8,128) constraint).
        total_bytes = itemsize * (
            B * input_size + B * hidden_size
            + input_size * hidden_size + hidden_size * hidden_size
            + B * hidden_size
        )
        vmem_limit = int(min(64 * MiB, max(32 * MiB, total_bytes + 2 * MiB)))
        out = pl.pallas_call(
            _rnn_cell_kernel,
            out_shape=out_shape,
            compiler_params=pltpu.CompilerParams(vmem_limit_bytes=vmem_limit),
        )(x, h, w_i, w_h)
    else:
        block_bytes = itemsize * (
            tb * input_size          # x tile
            + tb * hidden_size       # h tile
            + input_size * tn        # w_i tile
            + hidden_size * tn       # w_h tile
            + tb * tn                # out tile
        )
        # Double-buffered blocks + headroom, clamped so it also fits v7x's 64 MiB.
        vmem_limit = int(min(64 * MiB, max(32 * MiB, 2 * block_bytes + 2 * MiB)))
        out = pl.pallas_call(
            _rnn_cell_kernel,
            out_shape=out_shape,
            grid=(n_b, n_h),
            in_specs=[
                pl.BlockSpec((tb, input_size), lambda i, j: (i, 0)),
                pl.BlockSpec((tb, hidden_size), lambda i, j: (i, 0)),
                pl.BlockSpec((input_size, tn), lambda i, j: (0, j)),
                pl.BlockSpec((hidden_size, tn), lambda i, j: (0, j)),
            ],
            out_specs=pl.BlockSpec((tb, tn), lambda i, j: (i, j)),
            compiler_params=pltpu.CompilerParams(
                dimension_semantics=("parallel", "parallel"),
                vmem_limit_bytes=vmem_limit,
            ),
        )(x, h, w_i, w_h)

    return out if B_pad == B else out[:B]


def _reference(x, h, w_i, w_h):
    hp = jax.lax.Precision.HIGHEST
    return jnp.tanh(jnp.dot(h, w_h, precision=hp) + jnp.dot(x, w_i, precision=hp))


if __name__ == "__main__":
    key = jax.random.PRNGKey(0)
    k_x, k_h, k_wi, k_wh, k_x2, k_h2, k3 = jax.random.split(key, 7)

    # 1) Small shapes consistent with the module: batch=2, input_size=16, hidden=32.
    B, input_size, hidden_size = 2, 16, 32
    x = jax.random.normal(k_x, (B, input_size), dtype=jnp.float32)
    h = jax.random.normal(k_h, (B, hidden_size), dtype=jnp.float32)
    w_i = jax.random.normal(k_wi, (input_size, hidden_size), dtype=jnp.float32)
    w_h = jax.random.normal(k_wh, (hidden_size, hidden_size), dtype=jnp.float32)

    out = jax.block_until_ready(rnn_cell(x, h, w_i, w_h))
    ref = _reference(x, h, w_i, w_h)
    assert out.shape == (B, hidden_size)
    assert out.dtype == jnp.float32
    assert jnp.allclose(out, ref, atol=1e-4, rtol=1e-4), float(jnp.max(jnp.abs(out - ref)))

    # 2) Batch-tiled ("parallel" grid) path with an unaligned batch.
    #    B=300 with batch_block=128 -> balanced tiles of 104 rows, pads only to 312.
    B2 = 300
    x2 = jax.random.normal(k_x2, (B2, input_size), dtype=jnp.float32)
    h2 = jax.random.normal(k_h2, (B2, hidden_size), dtype=jnp.float32)
    out2 = jax.block_until_ready(rnn_cell(x2, h2, w_i, w_h, batch_block=128))
    ref2 = _reference(x2, h2, w_i, w_h)
    assert out2.shape == (B2, hidden_size)
    assert jnp.allclose(out2, ref2, atol=1e-4, rtol=1e-4), float(jnp.max(jnp.abs(out2 - ref2)))

    # 3) 2-D (batch x hidden) grid path: weight split along its output dim.
    #    Slightly looser tolerance absorbs f32 MXU multi-pass / accumulation-order drift.
    B3, in3, hid3 = 16, 64, 256
    kk = jax.random.split(k3, 4)
    x3 = jax.random.normal(kk[0], (B3, in3), dtype=jnp.float32)
    h3 = jax.random.normal(kk[1], (B3, hid3), dtype=jnp.float32)
    wi3 = jax.random.normal(kk[2], (in3, hid3), dtype=jnp.float32)
    wh3 = jax.random.normal(kk[3], (hid3, hid3), dtype=jnp.float32)
    out3 = jax.block_until_ready(
        rnn_cell(x3, h3, wi3, wh3, batch_block=8, hidden_block=128)
    )
    ref3 = _reference(x3, h3, wi3, wh3)
    assert out3.shape == (B3, hid3)
    assert jnp.allclose(out3, ref3, atol=2e-3, rtol=2e-3), float(jnp.max(jnp.abs(out3 - ref3)))

    print("KERNEL_OK")
</pallas_src>

<mosaic_0001>
module attributes {stable_mosaic.version = 11 : i64} {
  func.func @_rnn_cell_kernel(%arg0: memref<2x16xf32, #tpu.memory_space<vmem>>, %arg1: memref<2x32xf32, #tpu.memory_space<vmem>>, %arg2: memref<16x32xf32, #tpu.memory_space<vmem>>, %arg3: memref<32x32xf32, #tpu.memory_space<vmem>>, %arg4: memref<2x32xf32, #tpu.memory_space<vmem>>) attributes {dimension_semantics = [], scalar_prefetch = 0 : i64, scratch_operands = 0 : i64, tpu.core_type = #tpu.core_type<tc>} {
    %c0 = arith.constant 0 : index
    %c0_0 = arith.constant 0 : index
    %0 = vector.load %arg1[%c0, %c0_0] : memref<2x32xf32, #tpu.memory_space<vmem>>, vector<2x32xf32>
    %c0_1 = arith.constant 0 : index
    %c0_2 = arith.constant 0 : index
    %1 = vector.load %arg3[%c0_1, %c0_2] : memref<32x32xf32, #tpu.memory_space<vmem>>, vector<32x32xf32>
    %cst = arith.constant dense<0.000000e+00> : vector<2x32xf32>
    %2 = tpu.matmul %0, %1, %cst {dimension_numbers = #tpu.dot_dimension_numbers<[1], [0], [0], [1], [0, 0, 1, 1], [], []>} : vector<2x32xf32>, vector<32x32xf32>, vector<2x32xf32> -> vector<2x32xf32>
    %c0_3 = arith.constant 0 : index
    %c0_4 = arith.constant 0 : index
    %3 = vector.load %arg0[%c0_3, %c0_4] : memref<2x16xf32, #tpu.memory_space<vmem>>, vector<2x16xf32>
    %c0_5 = arith.constant 0 : index
    %c0_6 = arith.constant 0 : index
    %4 = vector.load %arg2[%c0_5, %c0_6] : memref<16x32xf32, #tpu.memory_space<vmem>>, vector<16x32xf32>
    %cst_7 = arith.constant dense<0.000000e+00> : vector<2x32xf32>
    %5 = tpu.matmul %3, %4, %cst_7 {dimension_numbers = #tpu.dot_dimension_numbers<[1], [0], [0], [1], [0, 0, 1, 1], [], []>} : vector<2x16xf32>, vector<16x32xf32>, vector<2x32xf32> -> vector<2x32xf32>
    %6 = arith.addf %2, %5 : vector<2x32xf32>
    %7 = math.tanh %6 : vector<2x32xf32>
    %c0_8 = arith.constant 0 : index
    %c0_9 = arith.constant 0 : index
    %8 = vector.load %arg4[%c0_8, %c0_9] : memref<2x32xf32, #tpu.memory_space<vmem>>, vector<2x32xf32>
    tpu.vector_store %arg4[%c0_8, %c0_9], %7 {strides = array<i32>} : memref<2x32xf32, #tpu.memory_space<vmem>>, vector<2x32xf32>,
    return
  }
}

</mosaic_0001>

<bundles_post_ra>
// kernel: tpu_custom_call.1
= control target key start
LH: loop header
LB: loop body
LE: loop exit
PB: predicated region body
PF: predicated region fallthrough
CT: control target
= control target key end

     0   :  { %9 = vsyncpa [#allocation3], 0  ;;  %s441_s0 = inlined_call_operand.hbm [shape: f32[2,16], index: 0, kind: input, shape index: {}]   ;;  %s442_s1 = inlined_call_operand.hbm [shape: f32[2,32], index: 1, kind: input, shape index: {}]   ;;  %s443_s2 = inlined_call_operand.hbm [shape: f32[16,32], index: 2, kind: input, shape index: {}]   ;;  %s444_s3 = inlined_call_operand.hbm [shape: f32[32,32], index: 3, kind: input, shape index: {}]   ;;  %s445_s4 = inlined_call_operand.hbm [shape: f32[2,32], index: 4, kind: output, shape index: {}]  }
   0x1   :  { %10 = vsyncpa [#allocation6], 0 }
   0x2   :  { %11 = vsyncpa [#allocation9], 0 }
   0x3   :  { %12 = vsyncpa [#allocation4], 0  ;;  %s392_s15 = smov [#allocation5]   ;;  %s393_s17 = smov [#allocation2]  }
   0x4   :  { %s29_s16 = sshll.u32 %s392_s15, 4  ;;  %s19_s18 = sshll.u32 %s393_s17, 4  ;;  %s30_s16 = int_to_ptr.vmem [resolvable:$true] %s29_s16  ;;  %s20_s18 = int_to_ptr.vmem [resolvable:$true] %s19_s18 }
   0x5   :  { %s292_s19 = scalar_lea.vmem %s30_s16, 32  ;;  %p297_p1 = scmp.lt.s32.totalorder %s30_s16, %s30_s16 }
   0x6   :  { %p293_p0 = scmp.ne.s32.totalorder %s30_s16, %s292_s19  ;;  %p298_p2 = scmp.lt.s32.totalorder %s292_s19, %s292_s19 }
   0x8   :  { %p299_p3 = por %p298_p2, %p297_p1 }
   0xa   :  { %p300_p4 = pnand %p299_p3, %p293_p0 }
   0xc   :  { %303 = shalt.err (!%p300_p4)
}
   0xd   :  { %32 = dma.hbm_to_vmem [thread:$0]  %s442_s1, 32, %s30_s16, [#allocation6]  }
   0xe   :  { %s312_s22 = scalar_lea.vmem %s20_s18, 32  ;;  %p317_p6 = scmp.lt.s32.totalorder %s20_s18, %s20_s18 }
   0xf   :  { %p313_p5 = scmp.ne.s32.totalorder %s20_s18, %s312_s22  ;;  %p318_p7 = scmp.lt.s32.totalorder %s312_s22, %s312_s22 }
  0x11   :  { %p319_p8 = por %p318_p7, %p317_p6 }
  0x13   :  { %p320_p9 = pnand %p319_p8, %p313_p5 }
  0x15   :  { %323 = shalt.err (!%p320_p9)
}
  0x16   :  { %22 = dma.hbm_to_vmem [thread:$0]  %s441_s0, 32, %s20_s18, [#allocation3]  }
  0x17   :  { %s394_s25 = smov [#allocation7]  }
  0x18   :  { %s38_s26 = sshll.u32 %s394_s25, 4  ;;  %s39_s26 = int_to_ptr.vmem [resolvable:$true] %s38_s26 }
  0x19   :  { %s332_s27 = scalar_lea.vmem %s39_s26, 256  ;;  %p337_p11 = scmp.lt.s32.totalorder %s39_s26, %s39_s26 }
  0x1a   :  { %p333_p10 = scmp.ne.s32.totalorder %s39_s26, %s332_s27  ;;  %p338_p12 = scmp.lt.s32.totalorder %s332_s27, %s332_s27 }
  0x1c   :  { %p339_p13 = por %p338_p12, %p337_p11 }
  0x1e   :  { %p340_p0 = pnand %p339_p13, %p333_p10 }
  0x20   :  { %343 = shalt.err (!%p340_p0)
}
  0x21   :  { %s395_s1 = smov 128   ;;  %s396_s28 = smov 8  }
  0x22   :  { %44 = dma.hbm_to_vmem [thread:$0]  %s443_s2, 256, %s39_s26, [#allocation6], %s395_s1, %s395_s1, %s396_s28  }
  0x23   :  { %s397_s5 = smov [#allocation8]  }
  0x24   :  { %s50_s6 = sshll.u32 %s397_s5, 4  ;;  %s51_s6 = int_to_ptr.vmem [resolvable:$true] %s50_s6 }
  0x25   :  { %s352_s0 = scalar_lea.vmem %s51_s6, 512  ;;  %p357_p2 = scmp.lt.s32.totalorder %s51_s6, %s51_s6 }
  0x26   :  { %p353_p1 = scmp.ne.s32.totalorder %s51_s6, %s352_s0  ;;  %p358_p3 = scmp.lt.s32.totalorder %s352_s0, %s352_s0 }
  0x28   :  { %p359_p4 = por %p358_p3, %p357_p2 }
  0x2a   :  { %p360_p5 = pnand %p359_p4, %p353_p1 }
  0x2c   :  { %363 = shalt.err (!%p360_p5)
}
  0x2d   :  { %56 = dma.hbm_to_vmem [thread:$0]  %s444_s3, 512, %s51_s6, [#allocation9], %s395_s1, %s395_s1, %s396_s28  }
  0x2e   :  { %384 = dma.done.wait [#allocation3], 32  }
  0x2f   :  { %385 = vsyncadd [#allocation3], 4294967264 }
  0x30   :  { %386 = dma.done.wait [#allocation6], 288  }
  0x31   :  { %387 = vsyncadd [#allocation6], 4294967008 }
  0x32   :  { %388 = dma.done.wait [#allocation9], 512  }
  0x33   :  { %389 = vsyncadd [#allocation9], 4294966784  ;;  %v398_v0 = vmov 0.0   ;;  %vm399_vm0 = vmmov 0   ;;  %v73_v1 = vld [vmem:[#allocation8 + $0x18] sm:$0xff]  ;;  %v72_v3 = vld [vmem:[#allocation8 + $0x10] sm:$0xff] }
  0x34   :  { %262 = vmatprep.subr.mxu1 %v398_v0  ;;  %255 = vmatprep.subr.mxu0 %v398_v0  ;;  %v76_v2 = vld [vmem:[#allocation7 + $0x8] sm:$0xff]  ;;  %v75_v4 = vld [vmem:[#allocation7] sm:$0xff]  ;;  %v74_v5 = vld [vmem:[#allocation2] sm:$0x3]  ;;  %vm77_vm1 = vcmask 130048   ;;  %vm151_vm2 = vcmask 261120  }
  0x35   :  { %259 = vmatprep.mubr.msk.f32.mxu0 %vm399_vm0, %v398_v0  ;;  %270 = vmatprep.mubr.msk.f32.mxu1 %vm399_vm0, %v398_v0  ;;  %v71_v6 = vld [vmem:[#allocation8 + $0x8] sm:$0xff]  ;;  %v70_v7 = vld [vmem:[#allocation8] sm:$0xff]  ;;  %s400_s2 = smov [#allocation10]   ;;  %vm226_vm3 = vcmask 254976  }
  0x36   :  { %263 = vmatpush3.msra.mxu1 %v73_v1  ;;  %256 = vmatpush3.msra.mxu0 %v76_v2  ;;  %v69_v8 = vld [vmem:[#allocation5] sm:$0x3]  ;;  %s234_s3 = sshll.u32 %s400_s2, 4  ;;  %s235_s3 = int_to_ptr.vmem [resolvable:$true] %s234_s3 }
  0x37   :  { %264 = vmatprep.subr.mxu1 %v398_v0  ;;  %257 = vmatprep.subr.mxu0 %v398_v0  ;;  %s364_s9 = scalar_lea.vmem %s235_s3, 32  ;;  %p369_p7 = scmp.lt.s32.totalorder %s235_s3, %s235_s3 }
  0x38   :  { %265 = vmatpush3.msra.mxu1 %v72_v3  ;;  %258 = vmatpush3.msra.mxu0 %v75_v4  ;;  %p365_p6 = scmp.ne.s32.totalorder %s235_s3, %s364_s9  ;;  %p370_p8 = scmp.lt.s32.totalorder %s364_s9, %s364_s9 }
  0x39   :  { %266 = vmatprep.subr.mxu1 %v398_v0  ;;  %260 = vmatmul.mubr.msk.f32.vlgmr.msra.gmra.mxu0 %vm77_vm1, %v74_v5 }
  0x3a   :  { %267 = vmatpush3.msra.mxu1 %v71_v6  ;;  %p371_p9 = por %p370_p8, %p369_p7 }
  0x3b   :  { %268 = vmatprep.subr.mxu1 %v398_v0 }
  0x3c   :  { %269 = vmatpush3.msra.mxu1 %v70_v7  ;;  %p372_p10 = pnand %p371_p9, %p365_p6 }
  0x3d   :  { %271 = vmatmul.mubr.msk.f32.vlgmr.msra.gmra.mxu1 %vm151_vm2, %v69_v8 }
  0xf9   :  { %v147_v9 = vpop.f32.mrf.mxu0 }
  0xfb   :  { %v261_v10 = vpop.f32.mrf.mxu0 }
  0xfd   :  { %v221_v11 = vpop.f32.mrf.mxu1 }
  0xfe   :  { %v222_v12 = vadd.f32 %v221_v11, %v147_v9 }
  0xff   :  { %v272_v13 = vpop.f32.mrf.mxu1 }
 0x100   :  { %282 = vtanh.f32 %v222_v12 }
 0x10d   :  { %v283_v14 = vpop.eup %282 }
 0x10e   :  { %227 = vst.msk [vmem:[#allocation10] sm:$0x3] %vm226_vm3, %v283_v14 }
 0x10f   :  { %375 = shalt.err (!%p372_p10)
}
 0x110   :  { %237 = dma.vmem_to_hbm [thread:$0]  %s235_s3, 32, %s445_s4, [#allocation4]  }
 0x111   :  { %390 = dma.done.wait [#allocation4], 32  }
 0x112   :  { %391 = vsyncadd [#allocation4], 4294967264 }
 0x113   :  { %241 = vsyncpa [#allocation3], 1 }
 0x114   :  { %242 = vsyncpa [#allocation6], 1 }
 0x115   :  { %243 = vsyncpa [#allocation9], 1 }
 0x116   :  { %244 = vsyncpa [#allocation4], 1 }

</bundles_post_ra>
